<compile_context>
chip_gen: v7x
topology: tpu7x:2x2x1
jax: 0.10.0
libtpu: 0.0.40
codegen_flags: <defaults>
</compile_context>

<pallas_src>
import jax
import jax.numpy as jnp
from jax.experimental import pallas as pl
from jax.experimental.pallas import tpu as pltpu

INNER_SIZE = 16          # `inner_size` in Net.__init__
NEG_SLOPE = 0.01         # torch leaky_relu default negative_slope
TILE_A_MAX = 2048        # atom rows per grid step (2048*16*4B = 128 KiB per h tile)


def _round_up(x, m):
    return (x + m - 1) // m * m


def net_kernel(h_ref, batch_ref, force_ref,
               w1x_ref, w1f_ref, b1_ref, w2_ref, b2_ref,
               out_ref, pooled_acc):
    """One grid step = one TILE_A-row slab of atoms.

    pooled_acc (B, D) persists in VMEM across the atom grid; the 17->16->1
    head runs only on the final grid step.
    """
    step = pl.program_id(0)

    @pl.when(step == 0)
    def _init():
        pooled_acc[...] = jnp.zeros_like(pooled_acc)

    h = h_ref[...]                 # (TILE_A, D) f32
    batch = batch_ref[...]         # (1, TILE_A) int32; padded atoms carry id == B
    B = pooled_acc.shape[0]
    ta = h.shape[0]

    # ---- Decoder: per-graph sum pooling via one-hot(batch) @ h on the MXU ----
    graph_ids = jax.lax.broadcasted_iota(jnp.int32, (B, ta), 0)      # (B, TILE_A)
    onehot = (graph_ids == batch).astype(jnp.float32)                # (B, TILE_A)
    pooled_acc[...] += jnp.dot(onehot, h, preferred_element_type=jnp.float32)

    @pl.when(step == pl.num_programs(0) - 1)
    def _head():
        pooled = pooled_acc[...]                                     # (B, D)
        # x = cat((pooled, force)); l1(x) == pooled @ W1x + force * W1f_row + b1
        z = jnp.dot(pooled, w1x_ref[...], preferred_element_type=jnp.float32)
        z = z + force_ref[...] * w1f_ref[...]      # (B,1)*(1,D) VPU broadcast (no K=1 MXU op)
        z = z + b1_ref[...]
        z = jnp.where(z > 0, z, NEG_SLOPE * z)     # leaky_relu
        # l2: N=1 matmul as VPU multiply + lane reduce instead of MXU
        out = jnp.sum(z * w2_ref[...], axis=-1, keepdims=True) + b2_ref[...]
        out_ref[...] = out                                           # (B, 1)


def net_forward(h_atm, batch_idx, force, w1, b1, w2, b2):
    """h_atm: (A, D) f32; batch_idx: (1, A) int32 graph id per atom; force: (B, 1) f32.
    w1: (D+1, D)  (torch Linear(17,16).weight.T), b1: (1, D)
    w2: (D, 1)    (torch Linear(16,1).weight.T),  b2: (1, 1)
    """
    A, D = h_atm.shape
    B = force.shape[0]

    w1x = w1[:D, :]                      # (D, D)  part multiplying pooled features
    w1f = w1[D:, :].reshape(1, D)        # (1, D)  part multiplying the force scalar
    w2_row = w2.reshape(1, D)            # (1, D)  row form for the VPU reduce

    # Pad the atom dimension so the grid tiles evenly; padded atoms get an
    # invalid graph id (== B) and are dropped by the one-hot compare.
    tile_a = min(TILE_A_MAX, _round_up(A, 128))
    a_pad = _round_up(A, tile_a)
    h_p = jnp.zeros((a_pad, D), h_atm.dtype).at[:A, :].set(h_atm)
    batch_p = jnp.full((1, a_pad), B, jnp.int32).at[:, :A].set(batch_idx.astype(jnp.int32))

    grid = (a_pad // tile_a,)
    const = lambda a: (0, 0)

    cost = pl.CostEstimate(
        flops=2 * a_pad * D * (B + 1),
        transcendentals=0,
        bytes_accessed=a_pad * D * 4 + a_pad * 4 + B * D * 4 + B * 4,
    )

    return pl.pallas_call(
        net_kernel,
        out_shape=jax.ShapeDtypeStruct((B, 1), jnp.float32),
        grid_spec=pltpu.PrefetchScalarGridSpec(
            num_scalar_prefetch=0,
            grid=grid,
            in_specs=[
                pl.BlockSpec((tile_a, D), lambda a: (a, 0)),   # h_atm slab (pipelined)
                pl.BlockSpec((1, tile_a), lambda a: (0, a)),   # batch-id slab (pipelined)
                pl.BlockSpec((B, 1), const),                   # force  (resident)
                pl.BlockSpec((D, D), const),                   # w1x    (resident)
                pl.BlockSpec((1, D), const),                   # w1f    (resident)
                pl.BlockSpec((1, D), const),                   # b1     (resident)
                pl.BlockSpec((1, D), const),                   # w2 row (resident)
                pl.BlockSpec((1, 1), const),                   # b2     (resident)
            ],
            out_specs=pl.BlockSpec((B, 1), const),
            scratch_shapes=[pltpu.VMEM((B, D), jnp.float32)],  # pooled accumulator
        ),
        compiler_params=pltpu.CompilerParams(
            dimension_semantics=("arbitrary",),                # accumulation axis
            vmem_limit_bytes=32 * 1024 * 1024,                 # safe on v5e/v6e/v7x
        ),
        cost_estimate=cost,
    )(h_p, batch_p, force, w1x, w1f, b1, w2_row, b2)


def reference_forward(h_atm, batch_idx, force, w1, b1, w2, b2):
    """Plain-JAX reference matching the PyTorch semantics."""
    B = force.shape[0]
    pooled = jax.ops.segment_sum(h_atm, batch_idx.reshape(-1), num_segments=B)
    x = jnp.concatenate([pooled, force], axis=-1)
    z = x @ w1 + b1
    z = jnp.where(z > 0, z, NEG_SLOPE * z)
    return z @ w2 + b2


if __name__ == "__main__":
    key = jax.random.PRNGKey(0)
    k_h, k_f, k_w1, k_b1, k_w2, k_b2 = jax.random.split(key, 6)

    B = 2                      # number of graphs
    A = 8                      # total atoms (4 per graph)
    D = INNER_SIZE             # 16

    # Stand-in for the ALIGNN encoder/processor output embeddings.
    h_atm = jax.random.normal(k_h, (A, D), dtype=jnp.float32)
    batch_idx = jnp.array([[0, 0, 0, 0, 1, 1, 1, 1]], dtype=jnp.int32)   # (1, A)
    force = jax.random.normal(k_f, (B, 1), dtype=jnp.float32)            # data.forcepair

    # Deterministic Linear parameters (shapes from nn.Linear(17,16), nn.Linear(16,1)).
    w1 = 0.1 * jax.random.normal(k_w1, (D + 1, D), dtype=jnp.float32)
    b1 = 0.1 * jax.random.normal(k_b1, (1, D), dtype=jnp.float32)
    w2 = 0.1 * jax.random.normal(k_w2, (D, 1), dtype=jnp.float32)
    b2 = 0.1 * jax.random.normal(k_b2, (1, 1), dtype=jnp.float32)

    out = net_forward(h_atm, batch_idx, force, w1, b1, w2, b2)
    out = jax.block_until_ready(out)

    ref = reference_forward(h_atm, batch_idx, force, w1, b1, w2, b2)
    assert out.shape == (B, 1)
    assert jnp.allclose(out, ref, atol=1e-5, rtol=1e-5), (out, ref)

    print("KERNEL_OK")
</pallas_src>

<mosaic_0001>
module attributes {stable_mosaic.version = 11 : i64} {
  func.func @net_kernel(%arg0: i32, %arg1: memref<128x16xf32, #tpu.memory_space<vmem>>, %arg2: memref<1x128xi32, #tpu.memory_space<vmem>>, %arg3: memref<2x1xf32, #tpu.memory_space<vmem>>, %arg4: memref<16x16xf32, #tpu.memory_space<vmem>>, %arg5: memref<1x16xf32, #tpu.memory_space<vmem>>, %arg6: memref<1x16xf32, #tpu.memory_space<vmem>>, %arg7: memref<1x16xf32, #tpu.memory_space<vmem>>, %arg8: memref<1x1xf32, #tpu.memory_space<vmem>>, %arg9: memref<2x1xf32, #tpu.memory_space<vmem>>, %arg10: memref<2x16xf32, #tpu.memory_space<vmem>>) attributes {dimension_semantics = [#tpu.dimension_semantics<arbitrary>], iteration_bounds = array<i64: 1>, scalar_prefetch = 0 : i64, scratch_operands = 1 : i64, tpu.core_type = #tpu.core_type<tc>, window_params = [{transform_indices = @transform_0, window_bounds = array<i64: 128, 16>}, {transform_indices = @transform_1, window_bounds = array<i64: 1, 128>}, {pipeline_mode = #tpu.pipeline_mode<synchronous>, transform_indices = @transform_2, window_bounds = array<i64: 2, 1>}, {pipeline_mode = #tpu.pipeline_mode<synchronous>, transform_indices = @transform_3, window_bounds = array<i64: 16, 16>}, {pipeline_mode = #tpu.pipeline_mode<synchronous>, transform_indices = @transform_4, window_bounds = array<i64: 1, 16>}, {pipeline_mode = #tpu.pipeline_mode<synchronous>, transform_indices = @transform_5, window_bounds = array<i64: 1, 16>}, {pipeline_mode = #tpu.pipeline_mode<synchronous>, transform_indices = @transform_6, window_bounds = array<i64: 1, 16>}, {pipeline_mode = #tpu.pipeline_mode<synchronous>, transform_indices = @transform_7, window_bounds = array<i64: 1, 1>}, {pipeline_mode = #tpu.pipeline_mode<synchronous>, transform_indices = @transform_8, window_bounds = array<i64: 2, 1>}]} {
    %c0_i32 = arith.constant 0 : i32
    %0 = arith.cmpi eq, %arg0, %c0_i32 : i32
    %1 = arith.extui %0 : i1 to i32
    %c0_i32_0 = arith.constant 0 : i32
    %2 = arith.cmpi ne, %1, %c0_i32_0 : i32
    scf.if %2 {
      %cst_10 = arith.constant 0.000000e+00 : f32
      %17 = vector.broadcast %cst_10 : f32 to vector<2x16xf32>
      %c0_11 = arith.constant 0 : index
      %c0_12 = arith.constant 0 : index
      %18 = vector.load %arg10[%c0_11, %c0_12] : memref<2x16xf32, #tpu.memory_space<vmem>>, vector<2x16xf32>
      tpu.vector_store %arg10[%c0_11, %c0_12], %17 {strides = array<i32>} : memref<2x16xf32, #tpu.memory_space<vmem>>, vector<2x16xf32>,
    } else {
    }
    %c0 = arith.constant 0 : index
    %c0_1 = arith.constant 0 : index
    %3 = vector.load %arg1[%c0, %c0_1] : memref<128x16xf32, #tpu.memory_space<vmem>>, vector<128x16xf32>
    %c0_2 = arith.constant 0 : index
    %c0_3 = arith.constant 0 : index
    %4 = vector.load %arg2[%c0_2, %c0_3] : memref<1x128xi32, #tpu.memory_space<vmem>>, vector<1x128xi32>
    %5 = tpu.iota {dimensions = array<i32: 0>} : vector<2x128xi32>
    %6 = vector.broadcast %4 : vector<1x128xi32> to vector<2x128xi32>
    %7 = arith.cmpi eq, %5, %6 : vector<2x128xi32>
    %8 = arith.extui %7 : vector<2x128xi1> to vector<2x128xi32>
    %9 = arith.sitofp %8 : vector<2x128xi32> to vector<2x128xf32>
    %c0_4 = arith.constant 0 : index
    %c0_5 = arith.constant 0 : index
    %10 = vector.load %arg10[%c0_4, %c0_5] : memref<2x16xf32, #tpu.memory_space<vmem>>, vector<2x16xf32>
    %cst = arith.constant dense<0.000000e+00> : vector<2x16xf32>
    %11 = tpu.matmul %9, %3, %cst {dimension_numbers = #tpu.dot_dimension_numbers<[1], [0], [0], [1], [0, 0, 1, 1], [], []>} : vector<2x128xf32>, vector<128x16xf32>, vector<2x16xf32> -> vector<2x16xf32>
    %12 = arith.addf %10, %11 : vector<2x16xf32>
    %c0_6 = arith.constant 0 : index
    %c0_7 = arith.constant 0 : index
    %13 = vector.load %arg10[%c0_6, %c0_7] : memref<2x16xf32, #tpu.memory_space<vmem>>, vector<2x16xf32>
    tpu.vector_store %arg10[%c0_6, %c0_7], %12 {strides = array<i32>} : memref<2x16xf32, #tpu.memory_space<vmem>>, vector<2x16xf32>,
    %c0_i32_8 = arith.constant 0 : i32
    %14 = arith.cmpi eq, %arg0, %c0_i32_8 : i32
    %15 = arith.extui %14 : i1 to i32
    %c0_i32_9 = arith.constant 0 : i32
    %16 = arith.cmpi ne, %15, %c0_i32_9 : i32
    scf.if %16 {
      %c0_10 = arith.constant 0 : index
      %c0_11 = arith.constant 0 : index
      %17 = vector.load %arg10[%c0_10, %c0_11] : memref<2x16xf32, #tpu.memory_space<vmem>>, vector<2x16xf32>
      %c0_12 = arith.constant 0 : index
      %c0_13 = arith.constant 0 : index
      %18 = vector.load %arg4[%c0_12, %c0_13] : memref<16x16xf32, #tpu.memory_space<vmem>>, vector<16x16xf32>
      %cst_14 = arith.constant dense<0.000000e+00> : vector<2x16xf32>
      %19 = tpu.matmul %17, %18, %cst_14 {dimension_numbers = #tpu.dot_dimension_numbers<[1], [0], [0], [1], [0, 0, 1, 1], [], []>} : vector<2x16xf32>, vector<16x16xf32>, vector<2x16xf32> -> vector<2x16xf32>
      %c0_15 = arith.constant 0 : index
      %c0_16 = arith.constant 0 : index
      %20 = vector.load %arg3[%c0_15, %c0_16] : memref<2x1xf32, #tpu.memory_space<vmem>>, vector<2x1xf32>
      %c0_17 = arith.constant 0 : index
      %c0_18 = arith.constant 0 : index
      %21 = vector.load %arg5[%c0_17, %c0_18] : memref<1x16xf32, #tpu.memory_space<vmem>>, vector<1x16xf32>
      %22 = vector.broadcast %20 : vector<2x1xf32> to vector<2x16xf32>
      %23 = vector.broadcast %21 : vector<1x16xf32> to vector<2x16xf32>
      %24 = arith.mulf %22, %23 : vector<2x16xf32>
      %25 = arith.addf %19, %24 : vector<2x16xf32>
      %c0_19 = arith.constant 0 : index
      %c0_20 = arith.constant 0 : index
      %26 = vector.load %arg6[%c0_19, %c0_20] : memref<1x16xf32, #tpu.memory_space<vmem>>, vector<1x16xf32>
      %27 = vector.broadcast %26 : vector<1x16xf32> to vector<2x16xf32>
      %28 = arith.addf %25, %27 : vector<2x16xf32>
      %cst_21 = arith.constant 0.000000e+00 : f32
      %29 = vector.broadcast %cst_21 : f32 to vector<2x16xf32>
      %30 = arith.cmpf ogt, %28, %29 : vector<2x16xf32>
      %cst_22 = arith.constant 0.00999999977 : f32
      %31 = vector.broadcast %cst_22 : f32 to vector<2x16xf32>
      %32 = arith.mulf %31, %28 : vector<2x16xf32>
      %33 = arith.select %30, %28, %32 : vector<2x16xi1>, vector<2x16xf32>
      %c0_23 = arith.constant 0 : index
      %c0_24 = arith.constant 0 : index
      %34 = vector.load %arg7[%c0_23, %c0_24] : memref<1x16xf32, #tpu.memory_space<vmem>>, vector<1x16xf32>
      %35 = vector.broadcast %34 : vector<1x16xf32> to vector<2x16xf32>
      %36 = arith.mulf %33, %35 : vector<2x16xf32>
      %cst_25 = arith.constant dense<0.000000e+00> : vector<2xf32>
      %37 = vector.multi_reduction <add>, %36, %cst_25 [1] : vector<2x16xf32> to vector<2xf32>
      %38 = vector.shape_cast %37 : vector<2xf32> to vector<2x1xf32>
      %c0_26 = arith.constant 0 : index
      %c0_27 = arith.constant 0 : index
      %39 = vector.load %arg8[%c0_26, %c0_27] : memref<1x1xf32, #tpu.memory_space<vmem>>, vector<1x1xf32>
      %40 = vector.broadcast %39 : vector<1x1xf32> to vector<2x1xf32>
      %41 = arith.addf %38, %40 : vector<2x1xf32>
      %c0_28 = arith.constant 0 : index
      %c0_29 = arith.constant 0 : index
      %42 = vector.load %arg9[%c0_28, %c0_29] : memref<2x1xf32, #tpu.memory_space<vmem>>, vector<2x1xf32>
      tpu.vector_store %arg9[%c0_28, %c0_29], %41 {strides = array<i32>} : memref<2x1xf32, #tpu.memory_space<vmem>>, vector<2x1xf32>,
    } else {
    }
    return
  }
  func.func @transform_0(%arg0: i32) -> (i32, i32) {
    %c0_i32 = arith.constant 0 : i32
    %c0_i32_0 = arith.constant 0 : i32
    return %arg0, %c0_i32 : i32, i32
  }
  func.func @transform_1(%arg0: i32) -> (i32, i32) {
    %c0_i32 = arith.constant 0 : i32
    %c0_i32_0 = arith.constant 0 : i32
    return %c0_i32, %arg0 : i32, i32
  }
  func.func @transform_2(%arg0: i32) -> (i32, i32) {
    %c0_i32 = arith.constant 0 : i32
    %c0_i32_0 = arith.constant 0 : i32
    %c0_i32_1 = arith.constant 0 : i32
    return %c0_i32, %c0_i32_0 : i32, i32
  }
  func.func @transform_3(%arg0: i32) -> (i32, i32) {
    %c0_i32 = arith.constant 0 : i32
    %c0_i32_0 = arith.constant 0 : i32
    %c0_i32_1 = arith.constant 0 : i32
    return %c0_i32, %c0_i32_0 : i32, i32
  }
  func.func @transform_4(%arg0: i32) -> (i32, i32) {
    %c0_i32 = arith.constant 0 : i32
    %c0_i32_0 = arith.constant 0 : i32
    %c0_i32_1 = arith.constant 0 : i32
    return %c0_i32, %c0_i32_0 : i32, i32
  }
  func.func @transform_5(%arg0: i32) -> (i32, i32) {
    %c0_i32 = arith.constant 0 : i32
    %c0_i32_0 = arith.constant 0 : i32
    %c0_i32_1 = arith.constant 0 : i32
    return %c0_i32, %c0_i32_0 : i32, i32
  }
  func.func @transform_6(%arg0: i32) -> (i32, i32) {
    %c0_i32 = arith.constant 0 : i32
    %c0_i32_0 = arith.constant 0 : i32
    %c0_i32_1 = arith.constant 0 : i32
    return %c0_i32, %c0_i32_0 : i32, i32
  }
  func.func @transform_7(%arg0: i32) -> (i32, i32) {
    %c0_i32 = arith.constant 0 : i32
    %c0_i32_0 = arith.constant 0 : i32
    %c0_i32_1 = arith.constant 0 : i32
    return %c0_i32, %c0_i32_0 : i32, i32
  }
  func.func @transform_8(%arg0: i32) -> (i32, i32) {
    %c0_i32 = arith.constant 0 : i32
    %c0_i32_0 = arith.constant 0 : i32
    %c0_i32_1 = arith.constant 0 : i32
    return %c0_i32, %c0_i32_0 : i32, i32
  }
}

</mosaic_0001>

<bundles_post_ra>
// kernel: tpu_custom_call.1
= control target key start
LH: loop header
LB: loop body
LE: loop exit
PB: predicated region body
PF: predicated region fallthrough
CT: control target
= control target key end

     0   :  { %vm35_vm0 = vcmask 123904   ;;  %v370_v0 = vmov 0.0|0.0   ;;  %v371_v4 = vmov 0.0   ;;  %vm372_vm1 = vmmov 0   ;;  %s498_s0 = inlined_call_operand.vmem [shape: f32[128,16], index: 0, kind: input, shape index: {}]   ;;  %s499_s1 = inlined_call_operand.vmem [shape: s32[1,128], index: 1, kind: input, shape index: {}]   ;;  %s500_s3 = inlined_call_operand.vmem [shape: f32[16,16], index: 3, kind: input, shape index: {}]   ;;  %s501_s2 = inlined_call_operand.vmem [shape: f32[2,1], index: 2, kind: input, shape index: {}]   ;;  %s502_s7 = inlined_call_operand.<no memory space> [shape: f32[1,1], index: 7, kind: input, shape index: {}]   ;;  %s503_s4 = inlined_call_operand.vmem [shape: f32[1,16], index: 4, kind: input, shape index: {}]   ;;  %s504_s5 = inlined_call_operand.vmem [shape: f32[1,16], index: 5, kind: input, shape index: {}]   ;;  %s505_s6 = inlined_call_operand.vmem [shape: f32[1,16], index: 6, kind: input, shape index: {}]   ;;  %s506_s8 = inlined_call_operand.vmem [shape: f32[2,1], index: 8, kind: output, shape index: {}]  }
   0x1   :  { %337 = vmatprep.subr.bf16.mxu0 %v370_v0  ;;  %v37_v1 = vld [vmem:[%s498_s0] sm:$0xff]  ;;  %v38_v2 = vld [vmem:[%s498_s0 + $0x8] sm:$0xff]  ;;  %v39_v3 = vld [vmem:[%s498_s0 + $0x10] sm:$0xff]  ;;  %36 = vst.msk [vmem:[#allocation2] sm:$0x3] %vm35_vm0, %v371_v4  ;;  %327 = vmatprep.mubr.msk.f32.mxu0 %vm372_vm1, %v371_v4  ;;  %v54_v23 = vlaneseq  ;;  %v373_v29 = vmov 1.0   ;;  %v13_v40 = vstv %s502_s7 }
   0x2   :  { %v338_v5 = vpack.c.bf16 %v38_v2, %v37_v1  ;;  %v40_v6 = vld [vmem:[%s498_s0 + $0x18] sm:$0xff]  ;;  %361 = vmatprep.subr.bf16.mxu1 %v370_v0  ;;  %334 = vmatprep.mubr.msk.f32.mxu1 %vm372_vm1, %v371_v4  ;;  %v41_v8 = vld [vmem:[%s498_s0 + $0x20] sm:$0xff]  ;;  %v42_v9 = vld [vmem:[%s498_s0 + $0x28] sm:$0xff]  ;;  %v374_v33 = vmov 0   ;;  %vm157_vm3 = vcmask 130048   ;;  %vm261_vm5 = vcmask 1024  }
   0x3   :  { %v341_v7 = vpack.c.bf16 %v40_v6, %v39_v3  ;;  %v344_v10 = vpack.c.bf16 %v42_v9, %v41_v8  ;;  %v43_v11 = vld [vmem:[%s498_s0 + $0x30] sm:$0xff]  ;;  %v44_v12 = vld [vmem:[%s498_s0 + $0x38] sm:$0xff]  ;;  %v45_v14 = vld [vmem:[%s498_s0 + $0x40] sm:$0xff]  ;;  %v55_v27 = vshrl.u32 %v54_v23, 7  ;;  %369 = vset.pattern.permute.xlu0 %v374_v33  ;;  %14 = vst [vmem:[#allocation3] sm:$0x1] %v13_v40 }
   0x4   :  { %339 = vmatpush3.bf16.msra.mxu0 %v338_v5  ;;  %v347_v13 = vpack.c.bf16 %v44_v12, %v43_v11  ;;  %v46_v15 = vld [vmem:[%s498_s0 + $0x48] sm:$0xff]  ;;  %v47_v17 = vld [vmem:[%s498_s0 + $0x50] sm:$0xff]  ;;  %v48_v18 = vld [vmem:[%s498_s0 + $0x58] sm:$0xff] }
   0x5   :  { %340 = vmatprep.subr.bf16.mxu0 %v370_v0  ;;  %v350_v16 = vpack.c.bf16 %v46_v15, %v45_v14  ;;  %v353_v19 = vpack.c.bf16 %v48_v18, %v47_v17  ;;  %v49_v20 = vld [vmem:[%s498_s0 + $0x60] sm:$0xff]  ;;  %v50_v21 = vld [vmem:[%s498_s0 + $0x68] sm:$0xff]  ;;  %v51_v24 = vld [vmem:[%s498_s0 + $0x70] sm:$0xff] }
   0x6   :  { %v356_v22 = vpack.c.bf16 %v50_v21, %v49_v20  ;;  %v52_v25 = vld [vmem:[%s498_s0 + $0x78] sm:$0xff]  ;;  %v267_v28 = vld [vmem:[%s499_s1] ss:$0 sm:$0xff]  ;;  %v142_v31 = vld [vmem:[%s500_s3 + $0x8] sm:$0xff] }
   0x7   :  { %v359_v26 = vpack.c.bf16 %v52_v25, %v51_v24  ;;  %vm60_vm2 = vcmp.eq.s32.totalorder %v55_v27, %v267_v28  ;;  %v141_v30 = vld [vmem:[%s500_s3] sm:$0xff] }
   0x8   :  { %342 = vmatpush3.bf16.msra.mxu0 %v341_v7  ;;  %v362_v32 = vpack.c.bf16 %v142_v31, %v141_v30  ;;  %v143_v34 = vld [vmem:[%s501_s2] sm:$0x3] }
   0x9   :  { %343 = vmatprep.subr.bf16.mxu0 %v370_v0  ;;  %147 = vperm.xlu0 %369, %v143_v34   ;;  %v63_v35 = vld [vmem:[#allocation2] sm:$0x3] }
   0xa   :  { %363 = vmatpush3.bf16.msra.mxu1 %v362_v32  ;;  %v270_v41 = vld [vmem:[%s503_s4] ss:$0 sm:$0xff]  ;;  %v274_v54 = vld [vmem:[#allocation3] ss:$0 sm:$0xff] }
   0xb   :  { %v272_v45 = vld [vmem:[%s504_s5] ss:$0 sm:$0xff] }
   0xc   :  { %345 = vmatpush3.bf16.msra.mxu0 %v344_v10  ;;  %v273_v50 = vld [vmem:[%s505_s6] ss:$0 sm:$0xff] }
   0xd   :  { %346 = vmatprep.subr.bf16.mxu0 %v370_v0 }
  0x10   :  { %348 = vmatpush3.bf16.msra.mxu0 %v347_v13 }
  0x11   :  { %349 = vmatprep.subr.bf16.mxu0 %v370_v0 }
  0x14   :  { %351 = vmatpush3.bf16.msra.mxu0 %v350_v16 }
  0x15   :  { %352 = vmatprep.subr.bf16.mxu0 %v370_v0 }
  0x18   :  { %354 = vmatpush3.bf16.msra.mxu0 %v353_v19 }
  0x19   :  { %355 = vmatprep.subr.bf16.mxu0 %v370_v0 }
  0x1c   :  { %357 = vmatpush3.bf16.msra.mxu0 %v356_v22 }
  0x1d   :  { %358 = vmatprep.subr.bf16.mxu0 %v370_v0 }
  0x20   :  { %360 = vmatpush3.bf16.msra.mxu0 %v359_v26 }
  0x23   :  { %328 = vmatmul.mubr.msk.f32.vlgmr.msra.gmra.mrb[0].mxu0 %vm60_vm2, %v373_v29 }
  0x88   :  { %v148_v42 = vpop.permute.xlu0 %147 }
  0x89   :  { %v156_v43 = vmul.f32 %v270_v41, %v148_v42 }
  0xf6   :  { %v130_v36 = vpop.f32.mrb[0].mxu0 }
  0xf7   :  { %v134_v37 = vadd.f32 %v130_v36, %v63_v35  ;;  %v329_v38 = vpop.f32.mrb[1].mxu0 }
  0xf9   :  { %136 = vst.msk [vmem:[#allocation2] sm:$0x3] %vm35_vm0, %v134_v37 }
 0x100   :  { %v140_v39 = vld [vmem:[#allocation2] sm:$0x3] }
 0x101   :  { %335 = vmatmul.mubr.msk.f32.vlgmr.msra.gmra.mrb[0].mxu1 %vm157_vm3, %v140_v39 }
 0x1d4   :  { %v227_v44 = vpop.f32.mrb[0].mxu1 }
 0x1d5   :  { %v228_v46 = vadd.f32 %v227_v44, %v156_v43  ;;  %v336_v47 = vpop.f32.mrb[1].mxu1 }
 0x1d7   :  { %v238_v48 = vadd.f32 %v272_v45, %v228_v46 }
 0x1d9   :  { %v240_v49 = vmul.f32 0.01, %v238_v48  ;;  %vm239_vm4 = vcmp.gt.f32.partialorder %v238_v48, 0.0 }
 0x1db   :  { %v241_v51 = vsel %vm239_vm4, %v238_v48, %v240_v49 }
 0x1dc   :  { %v249_v52 = vmul.f32 %v273_v50, %v241_v51 }
 0x1de   :  { %v250_v53 = vsel %vm35_vm0, %v249_v52, 0.0 }
 0x1df   :  { %251 = vadd.xlane.f32.xlu0 %v250_v53 }
 0x26c   :  { %v252_v55 = vpop.xlane.xlu0 %251 }
 0x26d   :  { %v260_v56 = vadd.f32 %v274_v54, %v252_v55 }
 0x26f   :  { %262 = vst.msk [vmem:[%s506_s8] sm:$0x3] %vm261_vm5, %v260_v56 }

</bundles_post_ra>
